<compile_context>
chip_gen: v6e
topology: v6e:2x2x1
jax: 0.10.0
libtpu: 0.0.40
codegen_flags: <defaults>
</compile_context>

<pallas_src>
import functools

import jax
import jax.numpy as jnp
from jax import lax
from jax.experimental import pallas as pl
from jax.experimental.pallas import tpu as pltpu


def _norm_reg_l1_kernel(ind_ref, feat_ref, mask_ref, target_ref,
                        absum_ref, pred_ref, *, n_obj, blk_b, unroll):
    """One grid step handles `blk_b` batch elements.

    ind_ref    : SMEM (B, N) int32          gather indices (scalar prefetch)
    feat_ref   : VMEM (blk_b, HW, C)        channel-last feature map
    mask_ref   : VMEM (blk_b, N, 1) f32     object mask
    target_ref : VMEM (blk_b, N, C) f32     regression targets
    absum_ref  : VMEM (1, 1, 1) f32         per-grid-step partial |diff| sum
    pred_ref   : VMEM (blk_b, N, C) f32     gathered-row staging buffer
    """
    g = pl.program_id(0)

    # ---- Phase 1: gather feature rows into the staging buffer. ------------
    # Independent iterations (scalar index load, one (1, C) vector load, one
    # (1, C) vector store): no accumulator dependency chain, so the unrolled
    # copies pipeline.  blk_b is capped small; fold the batch loop into the
    # grid / a fori_loop if blk_b is ever raised substantially.
    for bb in range(blk_b):
        b = g * blk_b + bb                     # global batch index into SMEM

        def gather(i, carry, bb=bb, b=b):
            row = feat_ref[bb, pl.ds(ind_ref[b, i], 1), :]     # (1, C)
            pred_ref[bb, pl.ds(i, 1), :] = row.astype(jnp.float32)
            return carry

        lax.fori_loop(0, n_obj, gather, 0, unroll=unroll)

    # ---- Phase 2: one dense full-width pass over the whole block. ---------
    t = target_ref[...]                                   # (blk_b, N, C) f32
    inv_t = pl.reciprocal(t + 1e-4, approx=False)         # hoisted out of loop
    pred = pred_ref[...]                                   # (blk_b, N, C) f32
    m = mask_ref[...]                                      # (blk_b, N, 1) f32
    # |pred*m - 1*m| == m * |pred - 1| for m >= 0 (fractional masks included).
    diff = m * jnp.abs(pred * inv_t - 1.0)
    partial = jnp.sum(diff, axis=0)                        # (N, C) vreg adds
    absum_ref[0, :, :] = jnp.sum(partial, keepdims=True)   # single XLU reduce


def _round_up(x, m):
    return ((x + m - 1) // m) * m


def _padded_block_bytes(shape, dtype):
    """VMEM footprint of a block after lane/sublane padding."""
    itemsize = jnp.dtype(dtype).itemsize
    sublane = {4: 8, 2: 16, 1: 32}.get(itemsize, 8)
    lead = 1
    for d in shape[:-2]:
        lead *= d
    return lead * _round_up(shape[-2], sublane) * _round_up(shape[-1], 128) * itemsize


def _pick_block_b(batch, hw, c, n, feat_dtype, cap=8, budget_bytes=20 << 20):
    """Largest divisor of `batch` (<= cap) whose PADDED VMEM footprint
    (double-buffered input blocks + staging scratch) fits the budget.
    Prefers grid_b >= 2 so a v7x megacore can split the 'parallel' axis."""
    per_batch = (2 * (_padded_block_bytes((1, hw, c), feat_dtype)
                      + _padded_block_bytes((1, n, 1), jnp.float32)
                      + _padded_block_bytes((1, n, c), jnp.float32))
                 + _padded_block_bytes((1, n, c), jnp.float32))     # pred scratch
    fits = [d for d in range(1, min(batch, cap) + 1)
            if batch % d == 0 and d * per_batch <= budget_bytes]
    if not fits:
        return 1
    multi_step = [d for d in fits if batch // d >= 2]
    return max(multi_step) if multi_step else max(fits)


def norm_reg_l1_loss(output, mask, ind, target):
    """output: (B,C,H,W), mask: (B,N), ind: (B,N) int, target: (B,N,C)."""
    B, C, H, W = output.shape
    N = ind.shape[1]
    HW = H * W

    # TODO(synk): this NCHW->NHWC transpose is an extra HBM round trip of the
    # feature map; produce channel-last activations upstream (or move to a
    # lane-dense (B, C, HW) layout with a dynamic-lane gather) to remove it.
    feat = jnp.transpose(output, (0, 2, 3, 1)).reshape(B, HW, C)   # keep dtype
    mask_f = mask.astype(jnp.float32)
    mask3 = mask_f.reshape(B, N, 1)
    target_f = target.astype(jnp.float32)
    # Clamp indices (matches take_along_axis clamping; avoids OOB VMEM reads).
    ind_i = jnp.clip(ind.astype(jnp.int32), 0, HW - 1)

    blk_b = _pick_block_b(B, HW, C, N, feat.dtype)
    grid_b = B // blk_b
    unroll = True if N <= 8 else 8        # 8 independent gather bodies in flight

    kernel = functools.partial(_norm_reg_l1_kernel,
                               n_obj=N, blk_b=blk_b, unroll=unroll)

    abs_parts = pl.pallas_call(
        kernel,
        out_shape=jax.ShapeDtypeStruct((grid_b, 1, 1), jnp.float32),
        grid_spec=pltpu.PrefetchScalarGridSpec(
            num_scalar_prefetch=1,          # ind -> SMEM
            grid=(grid_b,),
            in_specs=[
                pl.BlockSpec((blk_b, HW, C), lambda g, ind: (g, 0, 0)),  # feat
                pl.BlockSpec((blk_b, N, 1), lambda g, ind: (g, 0, 0)),   # mask
                pl.BlockSpec((blk_b, N, C), lambda g, ind: (g, 0, 0)),   # target
            ],
            out_specs=pl.BlockSpec((1, 1, 1), lambda g, ind: (g, 0, 0)),
            scratch_shapes=[
                pltpu.VMEM((blk_b, N, C), jnp.float32),  # gathered-pred staging
            ],
        ),
        compiler_params=pltpu.CompilerParams(
            dimension_semantics=("parallel",),   # per-block partials -> both TCs
            vmem_limit_bytes=32 << 20,
        ),
    )(ind_i, feat, mask3, target_f)

    # Final normalization: sum(expanded mask) == sum(mask) * C.
    denom = jnp.sum(mask_f) * C + 1e-4
    return jnp.sum(abs_parts) / denom


def _reference_loss(output, mask, ind, target):
    """Pure-JAX reference mirroring the PyTorch module."""
    B, C, H, W = output.shape
    feat = jnp.transpose(output, (0, 2, 3, 1)).reshape(B, H * W, C)
    idx = jnp.broadcast_to(ind[:, :, None].astype(jnp.int32), ind.shape + (C,))
    pred = jnp.take_along_axis(feat, idx, axis=1)                 # (B, N, C)
    m = jnp.broadcast_to(mask[:, :, None].astype(jnp.float32), pred.shape)
    p = pred / (target + 1e-4)
    t = jnp.ones_like(target)
    loss = jnp.sum(jnp.abs(p * m - t * m))
    return loss / (jnp.sum(m) + 1e-4)


if __name__ == "__main__":
    B, C, H, W, N = 2, 4, 16, 16, 8

    key = jax.random.PRNGKey(0)
    k1, k2, k3, k4 = jax.random.split(key, 4)

    output = jax.random.normal(k1, (B, C, H, W), dtype=jnp.float32)
    ind = jax.random.randint(k2, (B, N), 0, H * W, dtype=jnp.int32)
    mask = (jax.random.uniform(k3, (B, N)) > 0.3).astype(jnp.float32)
    target = jax.random.uniform(k4, (B, N, C), minval=0.5, maxval=2.0,
                                dtype=jnp.float32)

    loss = norm_reg_l1_loss(output, mask, ind, target)
    loss = jax.block_until_ready(loss)

    ref = jax.block_until_ready(_reference_loss(output, mask, ind, target))
    assert jnp.allclose(loss, ref, rtol=1e-5, atol=1e-5), (loss, ref)

    print("KERNEL_OK")
</pallas_src>

<mosaic_0001>
module attributes {stable_mosaic.version = 11 : i64} {
  func.func @_norm_reg_l1_kernel(%arg0: i32, %arg1: memref<2x8xi32, #tpu.memory_space<smem>>, %arg2: memref<1x256x4xf32, #tpu.memory_space<vmem>>, %arg3: memref<1x8x1xf32, #tpu.memory_space<vmem>>, %arg4: memref<1x8x4xf32, #tpu.memory_space<vmem>>, %arg5: memref<1x1x1xf32, #tpu.memory_space<vmem>>, %arg6: memref<1x8x4xf32, #tpu.memory_space<vmem>>) attributes {dimension_semantics = [#tpu.dimension_semantics<parallel>], iteration_bounds = array<i64: 2>, scalar_prefetch = 1 : i64, scratch_operands = 1 : i64, tpu.core_type = #tpu.core_type<tc>, window_params = [{transform_indices = @transform_0, window_bounds = array<i64: 1, 256, 4>}, {transform_indices = @transform_1, window_bounds = array<i64: 1, 8, 1>}, {transform_indices = @transform_2, window_bounds = array<i64: 1, 8, 4>}, {transform_indices = @transform_3, window_bounds = array<i64: 1, 1, 1>}]} {
    %c1_i32 = arith.constant 1 : i32
    %0 = arith.muli %arg0, %c1_i32 : i32
    %c0_i32 = arith.constant 0 : i32
    %1 = arith.addi %0, %c0_i32 : i32
    %c0_i32_0 = arith.constant 0 : i32
    %2 = arith.index_cast %1 : i32 to index
    %3 = arith.index_cast %c0_i32_0 : i32 to index
    %4 = memref.load %arg1[%2, %3] : memref<2x8xi32, #tpu.memory_space<smem>>
    %c0 = arith.constant 0 : index
    %5 = arith.index_cast %4 : i32 to index
    %c0_1 = arith.constant 0 : index
    %6 = vector.load %arg2[%c0, %5, %c0_1] : memref<1x256x4xf32, #tpu.memory_space<vmem>>, vector<1x1x4xf32>
    %7 = vector.shape_cast %6 : vector<1x1x4xf32> to vector<1x4xf32>
    %c0_2 = arith.constant 0 : index
    %8 = arith.index_cast %c0_i32_0 : i32 to index
    %c0_3 = arith.constant 0 : index
    %9 = vector.load %arg6[%c0_2, %8, %c0_3] : memref<1x8x4xf32, #tpu.memory_space<vmem>>, vector<1x1x4xf32>
    %10 = vector.shape_cast %9 : vector<1x1x4xf32> to vector<1x4xf32>
    %11 = vector.shape_cast %7 : vector<1x4xf32> to vector<1x1x4xf32>
    tpu.vector_store %arg6[%c0_2, %8, %c0_3], %11 {strides = array<i32>} : memref<1x8x4xf32, #tpu.memory_space<vmem>>, vector<1x1x4xf32>,
    %c1_i32_4 = arith.constant 1 : i32
    %12 = arith.index_cast %1 : i32 to index
    %13 = arith.index_cast %c1_i32_4 : i32 to index
    %14 = memref.load %arg1[%12, %13] : memref<2x8xi32, #tpu.memory_space<smem>>
    %c0_5 = arith.constant 0 : index
    %15 = arith.index_cast %14 : i32 to index
    %c0_6 = arith.constant 0 : index
    %16 = vector.load %arg2[%c0_5, %15, %c0_6] : memref<1x256x4xf32, #tpu.memory_space<vmem>>, vector<1x1x4xf32>
    %17 = vector.shape_cast %16 : vector<1x1x4xf32> to vector<1x4xf32>
    %c0_7 = arith.constant 0 : index
    %18 = arith.index_cast %c1_i32_4 : i32 to index
    %c0_8 = arith.constant 0 : index
    %19 = vector.load %arg6[%c0_7, %18, %c0_8] : memref<1x8x4xf32, #tpu.memory_space<vmem>>, vector<1x1x4xf32>
    %20 = vector.shape_cast %19 : vector<1x1x4xf32> to vector<1x4xf32>
    %21 = vector.shape_cast %17 : vector<1x4xf32> to vector<1x1x4xf32>
    tpu.vector_store %arg6[%c0_7, %18, %c0_8], %21 {strides = array<i32>} : memref<1x8x4xf32, #tpu.memory_space<vmem>>, vector<1x1x4xf32>,
    %c2_i32 = arith.constant 2 : i32
    %22 = arith.index_cast %1 : i32 to index
    %23 = arith.index_cast %c2_i32 : i32 to index
    %24 = memref.load %arg1[%22, %23] : memref<2x8xi32, #tpu.memory_space<smem>>
    %c0_9 = arith.constant 0 : index
    %25 = arith.index_cast %24 : i32 to index
    %c0_10 = arith.constant 0 : index
    %26 = vector.load %arg2[%c0_9, %25, %c0_10] : memref<1x256x4xf32, #tpu.memory_space<vmem>>, vector<1x1x4xf32>
    %27 = vector.shape_cast %26 : vector<1x1x4xf32> to vector<1x4xf32>
    %c0_11 = arith.constant 0 : index
    %28 = arith.index_cast %c2_i32 : i32 to index
    %c0_12 = arith.constant 0 : index
    %29 = vector.load %arg6[%c0_11, %28, %c0_12] : memref<1x8x4xf32, #tpu.memory_space<vmem>>, vector<1x1x4xf32>
    %30 = vector.shape_cast %29 : vector<1x1x4xf32> to vector<1x4xf32>
    %31 = vector.shape_cast %27 : vector<1x4xf32> to vector<1x1x4xf32>
    tpu.vector_store %arg6[%c0_11, %28, %c0_12], %31 {strides = array<i32>} : memref<1x8x4xf32, #tpu.memory_space<vmem>>, vector<1x1x4xf32>,
    %c3_i32 = arith.constant 3 : i32
    %32 = arith.index_cast %1 : i32 to index
    %33 = arith.index_cast %c3_i32 : i32 to index
    %34 = memref.load %arg1[%32, %33] : memref<2x8xi32, #tpu.memory_space<smem>>
    %c0_13 = arith.constant 0 : index
    %35 = arith.index_cast %34 : i32 to index
    %c0_14 = arith.constant 0 : index
    %36 = vector.load %arg2[%c0_13, %35, %c0_14] : memref<1x256x4xf32, #tpu.memory_space<vmem>>, vector<1x1x4xf32>
    %37 = vector.shape_cast %36 : vector<1x1x4xf32> to vector<1x4xf32>
    %c0_15 = arith.constant 0 : index
    %38 = arith.index_cast %c3_i32 : i32 to index
    %c0_16 = arith.constant 0 : index
    %39 = vector.load %arg6[%c0_15, %38, %c0_16] : memref<1x8x4xf32, #tpu.memory_space<vmem>>, vector<1x1x4xf32>
    %40 = vector.shape_cast %39 : vector<1x1x4xf32> to vector<1x4xf32>
    %41 = vector.shape_cast %37 : vector<1x4xf32> to vector<1x1x4xf32>
    tpu.vector_store %arg6[%c0_15, %38, %c0_16], %41 {strides = array<i32>} : memref<1x8x4xf32, #tpu.memory_space<vmem>>, vector<1x1x4xf32>,
    %c4_i32 = arith.constant 4 : i32
    %42 = arith.index_cast %1 : i32 to index
    %43 = arith.index_cast %c4_i32 : i32 to index
    %44 = memref.load %arg1[%42, %43] : memref<2x8xi32, #tpu.memory_space<smem>>
    %c0_17 = arith.constant 0 : index
    %45 = arith.index_cast %44 : i32 to index
    %c0_18 = arith.constant 0 : index
    %46 = vector.load %arg2[%c0_17, %45, %c0_18] : memref<1x256x4xf32, #tpu.memory_space<vmem>>, vector<1x1x4xf32>
    %47 = vector.shape_cast %46 : vector<1x1x4xf32> to vector<1x4xf32>
    %c0_19 = arith.constant 0 : index
    %48 = arith.index_cast %c4_i32 : i32 to index
    %c0_20 = arith.constant 0 : index
    %49 = vector.load %arg6[%c0_19, %48, %c0_20] : memref<1x8x4xf32, #tpu.memory_space<vmem>>, vector<1x1x4xf32>
    %50 = vector.shape_cast %49 : vector<1x1x4xf32> to vector<1x4xf32>
    %51 = vector.shape_cast %47 : vector<1x4xf32> to vector<1x1x4xf32>
    tpu.vector_store %arg6[%c0_19, %48, %c0_20], %51 {strides = array<i32>} : memref<1x8x4xf32, #tpu.memory_space<vmem>>, vector<1x1x4xf32>,
    %c5_i32 = arith.constant 5 : i32
    %52 = arith.index_cast %1 : i32 to index
    %53 = arith.index_cast %c5_i32 : i32 to index
    %54 = memref.load %arg1[%52, %53] : memref<2x8xi32, #tpu.memory_space<smem>>
    %c0_21 = arith.constant 0 : index
    %55 = arith.index_cast %54 : i32 to index
    %c0_22 = arith.constant 0 : index
    %56 = vector.load %arg2[%c0_21, %55, %c0_22] : memref<1x256x4xf32, #tpu.memory_space<vmem>>, vector<1x1x4xf32>
    %57 = vector.shape_cast %56 : vector<1x1x4xf32> to vector<1x4xf32>
    %c0_23 = arith.constant 0 : index
    %58 = arith.index_cast %c5_i32 : i32 to index
    %c0_24 = arith.constant 0 : index
    %59 = vector.load %arg6[%c0_23, %58, %c0_24] : memref<1x8x4xf32, #tpu.memory_space<vmem>>, vector<1x1x4xf32>
    %60 = vector.shape_cast %59 : vector<1x1x4xf32> to vector<1x4xf32>
    %61 = vector.shape_cast %57 : vector<1x4xf32> to vector<1x1x4xf32>
    tpu.vector_store %arg6[%c0_23, %58, %c0_24], %61 {strides = array<i32>} : memref<1x8x4xf32, #tpu.memory_space<vmem>>, vector<1x1x4xf32>,
    %c6_i32 = arith.constant 6 : i32
    %62 = arith.index_cast %1 : i32 to index
    %63 = arith.index_cast %c6_i32 : i32 to index
    %64 = memref.load %arg1[%62, %63] : memref<2x8xi32, #tpu.memory_space<smem>>
    %c0_25 = arith.constant 0 : index
    %65 = arith.index_cast %64 : i32 to index
    %c0_26 = arith.constant 0 : index
    %66 = vector.load %arg2[%c0_25, %65, %c0_26] : memref<1x256x4xf32, #tpu.memory_space<vmem>>, vector<1x1x4xf32>
    %67 = vector.shape_cast %66 : vector<1x1x4xf32> to vector<1x4xf32>
    %c0_27 = arith.constant 0 : index
    %68 = arith.index_cast %c6_i32 : i32 to index
    %c0_28 = arith.constant 0 : index
    %69 = vector.load %arg6[%c0_27, %68, %c0_28] : memref<1x8x4xf32, #tpu.memory_space<vmem>>, vector<1x1x4xf32>
    %70 = vector.shape_cast %69 : vector<1x1x4xf32> to vector<1x4xf32>
    %71 = vector.shape_cast %67 : vector<1x4xf32> to vector<1x1x4xf32>
    tpu.vector_store %arg6[%c0_27, %68, %c0_28], %71 {strides = array<i32>} : memref<1x8x4xf32, #tpu.memory_space<vmem>>, vector<1x1x4xf32>,
    %c7_i32 = arith.constant 7 : i32
    %72 = arith.index_cast %1 : i32 to index
    %73 = arith.index_cast %c7_i32 : i32 to index
    %74 = memref.load %arg1[%72, %73] : memref<2x8xi32, #tpu.memory_space<smem>>
    %c0_29 = arith.constant 0 : index
    %75 = arith.index_cast %74 : i32 to index
    %c0_30 = arith.constant 0 : index
    %76 = vector.load %arg2[%c0_29, %75, %c0_30] : memref<1x256x4xf32, #tpu.memory_space<vmem>>, vector<1x1x4xf32>
    %77 = vector.shape_cast %76 : vector<1x1x4xf32> to vector<1x4xf32>
    %c0_31 = arith.constant 0 : index
    %78 = arith.index_cast %c7_i32 : i32 to index
    %c0_32 = arith.constant 0 : index
    %79 = vector.load %arg6[%c0_31, %78, %c0_32] : memref<1x8x4xf32, #tpu.memory_space<vmem>>, vector<1x1x4xf32>
    %80 = vector.shape_cast %79 : vector<1x1x4xf32> to vector<1x4xf32>
    %81 = vector.shape_cast %77 : vector<1x4xf32> to vector<1x1x4xf32>
    tpu.vector_store %arg6[%c0_31, %78, %c0_32], %81 {strides = array<i32>} : memref<1x8x4xf32, #tpu.memory_space<vmem>>, vector<1x1x4xf32>,
    %c8_i32 = arith.constant 8 : i32
    %c0_33 = arith.constant 0 : index
    %c0_34 = arith.constant 0 : index
    %c0_35 = arith.constant 0 : index
    %82 = vector.load %arg4[%c0_33, %c0_34, %c0_35] : memref<1x8x4xf32, #tpu.memory_space<vmem>>, vector<1x8x4xf32>
    %cst = arith.constant 9.99999974E-5 : f32
    %83 = vector.broadcast %cst : f32 to vector<1x8x4xf32>
    %84 = arith.addf %82, %83 : vector<1x8x4xf32>
    %85 = tpu.reciprocal %84 : vector<1x8x4xf32> -> vector<1x8x4xf32>
    %c0_36 = arith.constant 0 : index
    %c0_37 = arith.constant 0 : index
    %c0_38 = arith.constant 0 : index
    %86 = vector.load %arg6[%c0_36, %c0_37, %c0_38] : memref<1x8x4xf32, #tpu.memory_space<vmem>>, vector<1x8x4xf32>
    %c0_39 = arith.constant 0 : index
    %c0_40 = arith.constant 0 : index
    %c0_41 = arith.constant 0 : index
    %87 = vector.load %arg3[%c0_39, %c0_40, %c0_41] : memref<1x8x1xf32, #tpu.memory_space<vmem>>, vector<1x8x1xf32>
    %88 = arith.mulf %86, %85 : vector<1x8x4xf32>
    %cst_42 = arith.constant 1.000000e+00 : f32
    %89 = vector.broadcast %cst_42 : f32 to vector<1x8x4xf32>
    %90 = arith.subf %88, %89 : vector<1x8x4xf32>
    %91 = math.absf %90 : vector<1x8x4xf32>
    %92 = vector.broadcast %87 : vector<1x8x1xf32> to vector<1x8x4xf32>
    %93 = arith.mulf %92, %91 : vector<1x8x4xf32>
    %cst_43 = arith.constant dense<0.000000e+00> : vector<8x4xf32>
    %94 = vector.multi_reduction <add>, %93, %cst_43 [0] : vector<1x8x4xf32> to vector<8x4xf32>
    %95 = vector.shape_cast %94 : vector<8x4xf32> to vector<1x8x4xf32>
    %cst_44 = arith.constant dense<0.000000e+00> : vector<1xf32>
    %96 = vector.multi_reduction <add>, %95, %cst_44 [1, 2] : vector<1x8x4xf32> to vector<1xf32>
    %97 = vector.shape_cast %96 : vector<1xf32> to vector<1x1x1xf32>
    %98 = vector.extract %97[0, 0, 0] : f32 from vector<1x1x1xf32>
    %99 = vector.broadcast %98 : f32 to vector<1x1xf32>
    %c0_45 = arith.constant 0 : index
    %c0_46 = arith.constant 0 : index
    %c0_47 = arith.constant 0 : index
    %100 = vector.load %arg5[%c0_45, %c0_46, %c0_47] : memref<1x1x1xf32, #tpu.memory_space<vmem>>, vector<1x1x1xf32>
    %101 = vector.shape_cast %100 : vector<1x1x1xf32> to vector<1x1xf32>
    %102 = vector.shape_cast %99 : vector<1x1xf32> to vector<1x1x1xf32>
    tpu.vector_store %arg5[%c0_45, %c0_46, %c0_47], %102 {strides = array<i32>} : memref<1x1x1xf32, #tpu.memory_space<vmem>>, vector<1x1x1xf32>,
    return
  }
  func.func @transform_0(%arg0: i32, %arg1: memref<2x8xi32, #tpu.memory_space<smem>>) -> (i32, i32, i32) {
    %c0_i32 = arith.constant 0 : i32
    %c0_i32_0 = arith.constant 0 : i32
    %c0_i32_1 = arith.constant 0 : i32
    return %arg0, %c0_i32, %c0_i32_0 : i32, i32, i32
  }
  func.func @transform_1(%arg0: i32, %arg1: memref<2x8xi32, #tpu.memory_space<smem>>) -> (i32, i32, i32) {
    %c0_i32 = arith.constant 0 : i32
    %c0_i32_0 = arith.constant 0 : i32
    %c0_i32_1 = arith.constant 0 : i32
    return %arg0, %c0_i32, %c0_i32_0 : i32, i32, i32
  }
  func.func @transform_2(%arg0: i32, %arg1: memref<2x8xi32, #tpu.memory_space<smem>>) -> (i32, i32, i32) {
    %c0_i32 = arith.constant 0 : i32
    %c0_i32_0 = arith.constant 0 : i32
    %c0_i32_1 = arith.constant 0 : i32
    return %arg0, %c0_i32, %c0_i32_0 : i32, i32, i32
  }
  func.func @transform_3(%arg0: i32, %arg1: memref<2x8xi32, #tpu.memory_space<smem>>) -> (i32, i32, i32) {
    %c0_i32 = arith.constant 0 : i32
    %c0_i32_0 = arith.constant 0 : i32
    %c0_i32_1 = arith.constant 0 : i32
    return %arg0, %c0_i32, %c0_i32_0 : i32, i32, i32
  }
}

</mosaic_0001>

<bundles_post_ra>
// kernel: tpu_custom_call.1
= control target key start
LH: loop header
LB: loop body
LE: loop exit
PB: predicated region body
PF: predicated region fallthrough
CT: control target
= control target key end

     0   :  { %s478_s0 = inlined_call_operand.vmem [shape: s32[2,8], index: 0, kind: input, shape index: {}]   ;;  %s479_s1 = inlined_call_operand.vmem [shape: f32[2,256,4], index: 1, kind: input, shape index: {}]   ;;  %s480_s2 = inlined_call_operand.vmem [shape: f32[2,8,1], index: 2, kind: input, shape index: {}]   ;;  %s481_s3 = inlined_call_operand.vmem [shape: f32[2,8,4], index: 3, kind: input, shape index: {}]   ;;  %s482_s4 = inlined_call_operand.vmem [shape: f32[2,1,1], index: 4, kind: output, shape index: {}]  }
   0x1   :  { %s9_s17 = sshll.u32 %s478_s0, 4  ;;  %s10_s17 = int_to_ptr.vmem [resolvable:$true] %s9_s17 }
   0x2   :  { %s386_s18 = scalar_lea.vmem %s10_s17, 32  ;;  %p391_p1 = scmp.lt.s32.totalorder %s10_s17, %s10_s17 }
   0x3   :  { %p387_p0 = scmp.ne.s32.totalorder %s10_s17, %s386_s18  ;;  %p392_p2 = scmp.lt.s32.totalorder %s386_s18, %s386_s18 }
   0x5   :  { %p393_p3 = por %p392_p2, %p391_p1 }
   0x7   :  { %p394_p4 = pnand %p393_p3, %p387_p0 }
   0x9   :  { %397 = shalt.err (!%p394_p4)  }
   0xa   :  { %s408_s19 = smov [#allocation4]  }
   0xb   :  { %12 = dma.vmem_to_smem %s10_s17, 32, %s408_s19, [#allocation3] }
   0xc   :  { %402 = dma.done.wait [#allocation3], 32 }
   0xd   :  { %403 = vsyncadd [#allocation3], 4294967264 }
   0xe   :  { %14 = sfence }
   0xf   :  { %s438_s20 = smov 0  }
  0x10 LB: > { %s357_s0 = sadd.s32 4294967295, %s406_s20   ;;  %p361_p5 = scmp.ge.s32.totalorder %s406_s20, 1  ;;  %s406_s20 = sphi %s438_s20, %s20_s20  }
  0x11   : > { %p162_p6 = scmp.lt.s32.totalorder %s406_s20, 3 }
  0x13   : > { %p163_p7 = pnand %p361_p5, %p162_p6 }
  0x14   : > { %p192_p8 = scmp.lt.s32.totalorder (!%p163_p7), %s357_s0, 1  ;;  %s366_s21 = sshll.u32 (!%p163_p7), %s357_s0, 7 }
  0x15   : > { %166 = sbr.rel (%p163_p7) target bundleno = 359 (0x167), region = 32  ;;  %s214_s22 = sadd.s32 (!%p163_p7), 1, %s366_s21 }
  0x16   : > { %s209_s23 = sld [smem:[#allocation4 + %s366_s21]] (!%p163_p7)  ;;  %s219_s24 = sadd.s32 (!%p163_p7), 2, %s366_s21 }
  0x17   : > { %s215_s26 = sld [smem:[#allocation4 + %s214_s22]] (!%p163_p7)  ;;  %s224_s5 = sadd.s32 (!%p163_p7), 3, %s366_s21 }
  0x18   : > { %s220_s30 = sld [smem:[#allocation4 + %s219_s24]] (!%p163_p7)  ;;  %s229_s6 = sadd.s32 (!%p163_p7), 4, %s366_s21 }
  0x19   : > { %s225_s7 = sld [smem:[#allocation4 + %s224_s5]] (!%p163_p7)  ;;  %s234_s8 = sadd.s32 (!%p163_p7), 5, %s366_s21 }
  0x1a   : > { %v409_v0 = vmov 0   ;;  %s484_s0 = smov (!%p192_p8, %s357_s0), 1  ;;  %s230_s9 = sld [smem:[#allocation4 + %s229_s6]]  ;;  %vm212_vm0 = vcmask 24576   ;;  %vm264_vm1 = vcmask 31744   ;;  %vm276_vm2 = vcmask 0  }
  0x1b   : > { %383 = vset.pattern.permute.xlu0 %v409_v0  ;;  %s364_s25 = sshll.u32 %s484_s0, 3  ;;  %s239_s10 = sadd.s32 6, %s366_s21 }
  0x1c   : > { %s200_s29 = scalar_lea.vmem %s480_s2, %s364_s25  ;;  %s235_s11 = sld [smem:[#allocation4 + %s234_s8]] }
  0x1d   : > { %v253_v1 = vld [vmem:[%s200_s29] sm:$0xff]  ;;  %s244_s12 = sadd.s32 7, %s366_s21  ;;  %s240_s13 = sld [smem:[#allocation4 + %s239_s10]] }
  0x1e   : > { %259 = vperm.xlu0 %383, %v253_v1   ;;  %s370_s14 = sshll.u32 %s484_s0, 8  ;;  %s245_s15 = sld [smem:[#allocation4 + %s244_s12]] }
  0x1f   : > { %s196_s18 = scalar_lea.vmem %s479_s1, %s370_s14  ;;  %s204_s5 = scalar_lea.vmem %s481_s3, %s364_s25 }
  0x20   : > { %s210_s19 = scalar_lea.vmem %s196_s18, %s209_s23  ;;  %s216_s22 = scalar_lea.vmem %s196_s18, %s215_s26  ;;  %v249_v10 = vld [vmem:[%s204_s5] sm:$0xff] }
  0x21   : > { %v211_v2 = vld [vmem:[%s210_s19] sm:$0x1]  ;;  %s221_s24 = scalar_lea.vmem %s196_s18, %s220_s30  ;;  %s226_s27 = scalar_lea.vmem %s196_s18, %s225_s7  ;;  %v250_v11 = vadd.f32 0.0001, %v249_v10 }
  0x22   : > { %v217_v3 = vld [vmem:[%s216_s22] sm:$0x1]  ;;  %213 = vst.msk [vmem:[#allocation2] sm:$0x1] %vm212_vm0, %v211_v2  ;;  %s231_s21 = scalar_lea.vmem %s196_s18, %s230_s9  ;;  %s236_s28 = scalar_lea.vmem %s196_s18, %s235_s11 }
  0x23   : > { %218 = vst.msk [vmem:[#allocation2 + $0x1] sm:$0x1] %vm212_vm0, %v217_v3  ;;  %v222_v4 = vld [vmem:[%s221_s24] sm:$0x1]  ;;  %s241_s23 = scalar_lea.vmem %s196_s18, %s240_s13  ;;  %384 = vrcp.f32 %v250_v11  ;;  %s207_s7 = scalar_lea.vmem %s482_s4, %s484_s0 }
  0x24   : > { %v227_v5 = vld [vmem:[%s226_s27] sm:$0x1]  ;;  %223 = vst.msk [vmem:[#allocation2 + $0x2] sm:$0x1] %vm212_vm0, %v222_v4  ;;  %s246_s26 = scalar_lea.vmem %s196_s18, %s245_s15 }
  0x25   : > { %228 = vst.msk [vmem:[#allocation2 + $0x3] sm:$0x1] %vm212_vm0, %v227_v5  ;;  %v232_v6 = vld [vmem:[%s231_s21] sm:$0x1] }
  0x26   : > { %233 = vst.msk [vmem:[#allocation2 + $0x4] sm:$0x1] %vm212_vm0, %v232_v6  ;;  %v237_v7 = vld [vmem:[%s236_s28] sm:$0x1] }
  0x27   : > { %238 = vst.msk [vmem:[#allocation2 + $0x5] sm:$0x1] %vm212_vm0, %v237_v7  ;;  %v242_v8 = vld [vmem:[%s241_s23] sm:$0x1] }
  0x28   : > { %243 = vst.msk [vmem:[#allocation2 + $0x6] sm:$0x1] %vm212_vm0, %v242_v8  ;;  %v247_v9 = vld [vmem:[%s246_s26] sm:$0x1] }
  0x29   : > { %248 = vst.msk [vmem:[#allocation2 + $0x7] sm:$0x1] %vm212_vm0, %v247_v9 }
  0x30   : > { %v385_v12 = vpop.eup %384  ;;  %v252_v13 = vld [vmem:[#allocation2] sm:$0xff] }
  0x31   : > { %v254_v14 = vmul.f32 %v385_v12, %v252_v13 }
  0x33   : > { %v367_v15 = vadd.f32 -1.0, %v254_v14 }
  0x35   : > { %v256_v16 = vand.u32 2147483647, %v367_v15 }
  0x99   : > { %v260_v17 = vpop.permute.xlu0 %259 }
  0x9a   : > { %v262_v18 = vmul.f32 %v260_v17, %v256_v16 }
  0x9c   : > { %v265_v19 = vsel %vm264_vm1, %v262_v18, 0.0 }
  0x9d   : > { %266 = vadd.xlane.f32.xlu0 %v265_v19 }
 0x126   : > { %v267_v20 = vpop.xlane.xlu0 %266 }
 0x127   : > { %v268_v21 = vrot.slane %v267_v20, 4 }
 0x129   : > { %v269_v22 = vadd.f32 %v268_v21, %v267_v20 }
 0x12b   : > { %v270_v23 = vrot.slane %v269_v22, 2 }
 0x12d   : > { %v271_v24 = vadd.f32 %v270_v23, %v269_v22 }
 0x12f   : > { %v272_v25 = vrot.slane %v271_v24, 1 }
 0x131   : > { %v273_v26 = vadd.f32 %v272_v25, %v271_v24 }
 0x133   : > { %371 = vpush %v273_v26 }
 0x164   : > { %s372_s8 = spop %371 }
 0x165   : > { %v275_v27 = vstv %s372_s8 }
 0x166   : > { %277 = vst.msk [vmem:[%s207_s7] sm:$0x1] %vm276_vm2, %v275_v27 }
 0x167 PF: > { %s20_s20 = sadd.s32 1, %s406_s20  }
 0x168   : > { %p17_p9 = scmp.ge.s32.totalorder %s20_s20, 4  }
 0x16a   :  { %19 = sbr.rel (!%p17_p9) target bundleno = 16 (0x10), region = 76 }

</bundles_post_ra>
